<compile_context>
chip_gen: v6e
topology: v6e:2x2x1
jax: 0.10.0
libtpu: 0.0.40
codegen_flags: <defaults>
</compile_context>

<pallas_src>
import functools

import jax
import jax.numpy as jnp
from jax.experimental import pallas as pl
from jax.experimental.pallas import tpu as pltpu


def _round_up(x, m):
    return (x + m - 1) // m * m


def _hash32(x):
    """lowbias32 integer finalizer using int32 ops only (portable lowering).

    Arithmetic right shift + mask == logical right shift for 32-bit values,
    and int32 multiplies wrap (two's complement), matching uint32 semantics.
    """
    x = x ^ ((x >> 16) & 0xFFFF)
    x = x * jnp.int32(0x7FEB352D)
    x = x ^ ((x >> 15) & 0x1FFFF)
    x = x * jnp.int32(-2073549173)        # 0x846CA68B as signed int32
    x = x ^ ((x >> 16) & 0xFFFF)
    return x


def _rnd_categorical_kernel(seed_ref, logits_ref, logprobs_ref, *, n_valid):
    """Generate U[0,1) logits and their log-softmax for one batch tile.

    seed_ref     : SMEM (1,)  int32 -- PRNG seed
    logits_ref   : VMEM (Tb, Np) f32 -- raw uniform logits
    logprobs_ref : VMEM (Tb, Np) f32 -- log-softmax over the first n_valid cols
    """
    shape = logits_ref.shape              # (tile_b, np_pad)
    tile_b, np_pad = shape

    # Unique 32-bit counter per (global row, col); tiles draw disjoint streams.
    row0 = pl.program_id(0) * tile_b
    row = jax.lax.broadcasted_iota(jnp.int32, shape, 0) + row0
    col = jax.lax.broadcasted_iota(jnp.int32, shape, 1)
    ctr = row * np_pad + col + seed_ref[0] * jnp.int32(-1640531527)  # 0x9E3779B9

    h = _hash32(ctr)
    mant = (h >> 9) & 0x7FFFFF            # 23 random bits in [0, 2^23)
    u = mant.astype(jnp.float32) * jnp.float32(1.0 / (1 << 23))      # U[0, 1)

    logits_ref[...] = u

    # log-softmax (what torch.distributions.Categorical does with `logits`).
    if n_valid != np_pad:
        masked = jnp.where(col < n_valid, u, jnp.float32(-1e30))
    else:
        masked = u                         # aligned case: no masking VALU filler
    m = jnp.max(masked, axis=-1, keepdims=True)
    s = jnp.sum(jnp.exp(masked - m), axis=-1, keepdims=True)  # exp(-1e30-m) == 0
    lse = m + jnp.log(s)
    logprobs_ref[...] = u - lse


def rnd_categorical_forward(x, num_outputs, seed=0):
    """Pallas equivalent of RndCategorical.forward.

    Returns (logits, log_probs), both (x.shape[0], num_outputs) float32.
    """
    b = x.shape[0]
    np_ = _round_up(max(num_outputs, 1), 128)   # lane-align
    bp8 = _round_up(max(b, 1), 8)               # sublane-align

    # Batch tile: big enough to pipeline HBM writeback, small enough that
    # 2 outputs x 2 pipeline buffers x tile stay well under the scoped VMEM
    # limit on every chip (incl. v7x's 64 MiB physical / 32 MiB scoped).
    vmem_budget = 8 * 1024 * 1024
    budget_rows = max(8, vmem_budget // (np_ * 4 * 2 * 2))
    tile_b = min(1024, budget_rows, bp8)
    tile_b = max(8, (tile_b // 8) * 8)
    bp = _round_up(bp8, tile_b)
    grid_b = bp // tile_b

    seed_arr = jnp.asarray([seed], dtype=jnp.int32)

    kernel = functools.partial(_rnd_categorical_kernel, n_valid=num_outputs)

    logits_p, logprobs_p = pl.pallas_call(
        kernel,
        out_shape=(
            jax.ShapeDtypeStruct((bp, np_), jnp.float32),
            jax.ShapeDtypeStruct((bp, np_), jnp.float32),
        ),
        grid=(grid_b,),
        in_specs=[pl.BlockSpec(memory_space=pltpu.MemorySpace.SMEM)],
        out_specs=(
            pl.BlockSpec((tile_b, np_), lambda i: (i, 0)),
            pl.BlockSpec((tile_b, np_), lambda i: (i, 0)),
        ),
        compiler_params=pltpu.CompilerParams(
            dimension_semantics=("parallel",)),
    )(seed_arr)

    if bp == b and np_ == num_outputs:
        # Exact shapes: no wrapper-side slice, no extra HBM round trip.
        return logits_p, logprobs_p
    return logits_p[:b, :num_outputs], logprobs_p[:b, :num_outputs]


class FixedCategorical:
    """Minimal stand-in for the torch FixedCategorical distribution object."""

    def __init__(self, logits, log_probs):
        self.logits = logits              # raw uniform logits, as in the module
        self._log_probs = log_probs       # normalized log-probs (torch-internal)

    def probs(self):
        return jnp.exp(self._log_probs)

    def mode(self):
        return jnp.argmax(self._log_probs, axis=-1)

    def sample(self, key):
        return jax.random.categorical(key, self._log_probs, axis=-1)


class RndCategorical:
    """JAX/Pallas port of the PyTorch RndCategorical module."""

    def __init__(self, num_inputs, num_outputs, args=None):
        self.args = args
        self.num_inputs = num_inputs
        self.num_outputs = num_outputs
        # No learnable parameters in the original module.

    def forward(self, x, add_input=None, seed=0):
        logits, log_probs = rnd_categorical_forward(x, self.num_outputs, seed=seed)
        return FixedCategorical(logits, log_probs)


if __name__ == "__main__":
    key = jax.random.PRNGKey(0)
    kx, ka = jax.random.split(key)

    batch = 2
    num_inputs = 32
    num_outputs = 8

    x = jax.random.normal(kx, (batch, num_inputs), dtype=jnp.float32)
    add_input = jax.random.normal(ka, (batch, 4), dtype=jnp.float32)  # ignored, as in torch

    model = RndCategorical(num_inputs, num_outputs, args=None)
    dist = model.forward(x, add_input, seed=0)

    logits = jax.block_until_ready(dist.logits)
    log_probs = jax.block_until_ready(dist._log_probs)

    assert logits.shape == (batch, num_outputs)
    assert log_probs.shape == (batch, num_outputs)
    # Uniform[0,1) logits and a valid normalized distribution.
    assert bool(jnp.all((logits >= 0.0) & (logits < 1.0)))
    assert bool(jnp.allclose(jnp.sum(jnp.exp(log_probs), axis=-1), 1.0, atol=1e-5))
    assert bool(jnp.allclose(log_probs, jax.nn.log_softmax(logits, axis=-1), atol=1e-5))
    # Deterministic for a fixed seed.
    dist2 = model.forward(x, add_input, seed=0)
    assert bool(jnp.array_equal(jax.block_until_ready(dist2.logits), logits))

    # Multi-tile batch path (exercises the batch grid + per-tile streams).
    big_b = 2051
    x_big = jnp.zeros((big_b, num_inputs), dtype=jnp.float32)
    dist_big = model.forward(x_big, None, seed=7)
    logits_big = jax.block_until_ready(dist_big.logits)
    assert logits_big.shape == (big_b, num_outputs)
    assert bool(jnp.all((logits_big >= 0.0) & (logits_big < 1.0)))
    assert not bool(jnp.allclose(logits_big[:8], logits_big[1024:1032]))

    print("KERNEL_OK")
</pallas_src>

<mosaic_0001>
module attributes {stable_mosaic.version = 11 : i64} {
  func.func @_rnd_categorical_kernel(%arg0: i32, %arg1: memref<1xi32, #tpu.memory_space<smem>>, %arg2: memref<8x128xf32, #tpu.memory_space<vmem>>, %arg3: memref<8x128xf32, #tpu.memory_space<vmem>>) attributes {dimension_semantics = [#tpu.dimension_semantics<parallel>], iteration_bounds = array<i64: 1>, scalar_prefetch = 0 : i64, scratch_operands = 0 : i64, tpu.core_type = #tpu.core_type<tc>, window_params = [{transform_indices = @transform_0, window_bounds = array<i64: 1>}, {transform_indices = @transform_1, window_bounds = array<i64: 8, 128>}, {transform_indices = @transform_2, window_bounds = array<i64: 8, 128>}]} {
    %c8_i32 = arith.constant 8 : i32
    %0 = arith.muli %arg0, %c8_i32 : i32
    %1 = tpu.iota {dimensions = array<i32: 0>} : vector<8x128xi32>
    %2 = vector.broadcast %0 : i32 to vector<8x128xi32>
    %3 = arith.addi %1, %2 : vector<8x128xi32>
    %4 = tpu.iota {dimensions = array<i32: 1>} : vector<8x128xi32>
    %c128_i32 = arith.constant 128 : i32
    %5 = vector.broadcast %c128_i32 : i32 to vector<8x128xi32>
    %6 = arith.muli %3, %5 : vector<8x128xi32>
    %7 = arith.addi %6, %4 : vector<8x128xi32>
    %c0 = arith.constant 0 : index
    %8 = memref.load %arg1[%c0] : memref<1xi32, #tpu.memory_space<smem>>
    %c-1640531527_i32 = arith.constant -1640531527 : i32
    %9 = arith.muli %8, %c-1640531527_i32 : i32
    %10 = vector.broadcast %9 : i32 to vector<8x128xi32>
    %11 = arith.addi %7, %10 : vector<8x128xi32>
    %c16_i32 = arith.constant 16 : i32
    %12 = vector.broadcast %c16_i32 : i32 to vector<8x128xi32>
    %13 = arith.shrsi %11, %12 : vector<8x128xi32>
    %c65535_i32 = arith.constant 65535 : i32
    %14 = vector.broadcast %c65535_i32 : i32 to vector<8x128xi32>
    %15 = arith.andi %13, %14 : vector<8x128xi32>
    %16 = arith.xori %11, %15 : vector<8x128xi32>
    %c2146121005_i32 = arith.constant 2146121005 : i32
    %17 = vector.broadcast %c2146121005_i32 : i32 to vector<8x128xi32>
    %18 = arith.muli %16, %17 : vector<8x128xi32>
    %c15_i32 = arith.constant 15 : i32
    %19 = vector.broadcast %c15_i32 : i32 to vector<8x128xi32>
    %20 = arith.shrsi %18, %19 : vector<8x128xi32>
    %c131071_i32 = arith.constant 131071 : i32
    %21 = vector.broadcast %c131071_i32 : i32 to vector<8x128xi32>
    %22 = arith.andi %20, %21 : vector<8x128xi32>
    %23 = arith.xori %18, %22 : vector<8x128xi32>
    %c-2073549173_i32 = arith.constant -2073549173 : i32
    %24 = vector.broadcast %c-2073549173_i32 : i32 to vector<8x128xi32>
    %25 = arith.muli %23, %24 : vector<8x128xi32>
    %c16_i32_0 = arith.constant 16 : i32
    %26 = vector.broadcast %c16_i32_0 : i32 to vector<8x128xi32>
    %27 = arith.shrsi %25, %26 : vector<8x128xi32>
    %c65535_i32_1 = arith.constant 65535 : i32
    %28 = vector.broadcast %c65535_i32_1 : i32 to vector<8x128xi32>
    %29 = arith.andi %27, %28 : vector<8x128xi32>
    %30 = arith.xori %25, %29 : vector<8x128xi32>
    %c9_i32 = arith.constant 9 : i32
    %31 = vector.broadcast %c9_i32 : i32 to vector<8x128xi32>
    %32 = arith.shrsi %30, %31 : vector<8x128xi32>
    %c8388607_i32 = arith.constant 8388607 : i32
    %33 = vector.broadcast %c8388607_i32 : i32 to vector<8x128xi32>
    %34 = arith.andi %32, %33 : vector<8x128xi32>
    %35 = arith.sitofp %34 : vector<8x128xi32> to vector<8x128xf32>
    %cst = arith.constant 1.1920929E-7 : f32
    %36 = vector.broadcast %cst : f32 to vector<8x128xf32>
    %37 = arith.mulf %35, %36 : vector<8x128xf32>
    %c0_2 = arith.constant 0 : index
    %c0_3 = arith.constant 0 : index
    %38 = vector.load %arg2[%c0_2, %c0_3] : memref<8x128xf32, #tpu.memory_space<vmem>>, vector<8x128xf32>
    tpu.vector_store %arg2[%c0_2, %c0_3], %37 {strides = array<i32>} : memref<8x128xf32, #tpu.memory_space<vmem>>, vector<8x128xf32>,
    %c8_i32_4 = arith.constant 8 : i32
    %39 = vector.broadcast %c8_i32_4 : i32 to vector<8x128xi32>
    %40 = arith.cmpi slt, %4, %39 : vector<8x128xi32>
    %cst_5 = arith.constant -1.000000e+30 : f32
    %41 = vector.broadcast %cst_5 : f32 to vector<8x128xf32>
    %42 = arith.select %40, %37, %41 : vector<8x128xi1>, vector<8x128xf32>
    %cst_6 = arith.constant dense<0xFF800000> : vector<8xf32>
    %43 = vector.multi_reduction <maximumf>, %42, %cst_6 [1] : vector<8x128xf32> to vector<8xf32>
    %44 = vector.shape_cast %43 : vector<8xf32> to vector<8x1xf32>
    %45 = vector.broadcast %44 : vector<8x1xf32> to vector<8x128xf32>
    %46 = arith.subf %42, %45 : vector<8x128xf32>
    %47 = math.exp %46 : vector<8x128xf32>
    %cst_7 = arith.constant dense<0.000000e+00> : vector<8xf32>
    %48 = vector.multi_reduction <add>, %47, %cst_7 [1] : vector<8x128xf32> to vector<8xf32>
    %49 = vector.shape_cast %48 : vector<8xf32> to vector<8x1xf32>
    %50 = math.log %49 : vector<8x1xf32>
    %51 = arith.addf %44, %50 : vector<8x1xf32>
    %52 = vector.broadcast %51 : vector<8x1xf32> to vector<8x128xf32>
    %53 = arith.subf %37, %52 : vector<8x128xf32>
    %c0_8 = arith.constant 0 : index
    %c0_9 = arith.constant 0 : index
    %54 = vector.load %arg3[%c0_8, %c0_9] : memref<8x128xf32, #tpu.memory_space<vmem>>, vector<8x128xf32>
    tpu.vector_store %arg3[%c0_8, %c0_9], %53 {strides = array<i32>} : memref<8x128xf32, #tpu.memory_space<vmem>>, vector<8x128xf32>,
    return
  }
  func.func @transform_0(%arg0: i32) -> i32 {
    %c0_i32 = arith.constant 0 : i32
    %c0_i32_0 = arith.constant 0 : i32
    return %c0_i32 : i32
  }
  func.func @transform_1(%arg0: i32) -> (i32, i32) {
    %c0_i32 = arith.constant 0 : i32
    %c0_i32_0 = arith.constant 0 : i32
    return %arg0, %c0_i32 : i32, i32
  }
  func.func @transform_2(%arg0: i32) -> (i32, i32) {
    %c0_i32 = arith.constant 0 : i32
    %c0_i32_0 = arith.constant 0 : i32
    return %arg0, %c0_i32 : i32, i32
  }
}

</mosaic_0001>

<bundles_post_ra>
// kernel: tpu_custom_call.1
= control target key start
LH: loop header
LB: loop body
LE: loop exit
PB: predicated region body
PF: predicated region fallthrough
CT: control target
= control target key end

     0   :  { %9 = vsyncpa [#allocation4], 0  ;;  %v14_v0 = vlaneseq  ;;  %s164_s0 = inlined_call_operand.<no memory space> [shape: s32[1], index: 0, kind: input, shape index: {}]   ;;  %s165_s1 = inlined_call_operand.hbm [shape: f32[8,128], index: 1, kind: output, shape index: {0}]   ;;  %s166_s2 = inlined_call_operand.hbm [shape: f32[8,128], index: 2, kind: output, shape index: {1}]  }
   0x1   :  { %10 = vsyncpa [#allocation6], 0  ;;  %s23_s11 = smul.u32 2654435769, %s164_s0  ;;  %s138_s0 = smov [#allocation3]  }
   0x2   :  { %v15_v1 = vshrl.u32 %v14_v0, 7  ;;  %v19_v2 = vand.u32 127, %v14_v0  ;;  %s62_s12 = sshll.u32 %s138_s0, 4  ;;  %s63_s12 = int_to_ptr.vmem [resolvable:$true] %s62_s12 }
   0x3   :  { %v24_v4 = vstv %s23_s11  ;;  %s94_s13 = scalar_lea.vmem %s63_s12, 128  ;;  %p99_p1 = scmp.lt.s32.totalorder %s63_s12, %s63_s12 }
   0x4   :  { %v20_v3 = vmul.u32 128, %v15_v1  ;;  %vm42_vm0 = vcmp.lt.s32.totalorder %v19_v2, 8  ;;  %p95_p0 = scmp.ne.s32.totalorder %s63_s12, %s94_s13  ;;  %p100_p2 = scmp.lt.s32.totalorder %s94_s13, %s94_s13 }
   0x6   :  { %v21_v5 = vadd.s32 %v20_v3, %v19_v2  ;;  %p101_p3 = por %p100_p2, %p99_p1 }
   0x8   :  { %v25_v6 = vadd.s32 %v24_v4, %v21_v5  ;;  %p102_p4 = pnand %p101_p3, %p95_p0 }
   0xa   :  { %v84_v7 = vshrl.u32 %v25_v6, 16 }
   0xc   :  { %v28_v8 = vxor.u32 %v84_v7, %v25_v6 }
   0xe   :  { %v29_v9 = vmul.u32 2146121005, %v28_v8 }
  0x10   :  { %v85_v10 = vshrl.u32 %v29_v9, 15 }
  0x12   :  { %v32_v11 = vxor.u32 %v85_v10, %v29_v9 }
  0x14   :  { %v33_v12 = vmul.u32 2221418123, %v32_v11 }
  0x16   :  { %v86_v13 = vshrl.u32 %v33_v12, 16 }
  0x18   :  { %v36_v14 = vxor.u32 %v86_v13, %v33_v12 }
  0x1a   :  { %v87_v15 = vshrl.u32 %v36_v14, 9 }
  0x1c   :  { %v39_v16 = vcvt.s32.f32 %v87_v15 }
  0x1e   :  { %v40_v17 = vmul.f32 1.1920929e-07, %v39_v16 }
  0x20   :  { %v43_v18 = vsel %vm42_vm0, %v40_v17, -1e+30  ;;  %41 = vst [vmem:[#allocation3] sm:$0xff] %v40_v17 }
  0x21   :  { %44 = vmax.xlane.f32.xlu0 %v43_v18 }
  0xaa   :  { %v45_v19 = vpop.xlane.xlu0 %44 }
  0xab   :  { %v46_v20 = vsub.f32 %v43_v18, %v45_v19 }
  0xad   :  { %v47_v21 = vmul.f32 1.442695, %v46_v20 }
  0xaf   :  { %90 = vpow2.f32 %v47_v21 }
  0xbc   :  { %v91_v22 = vpop.eup %90 }
  0xbd   :  { %49 = vadd.xlane.f32.xlu0 %v91_v22 }
  0xbe   :  { %105 = shalt.err (!%p102_p4)
}
  0xbf   :  { %65 = dma.vmem_to_hbm [thread:$0]  %s63_s12, 128, %s165_s1, [#allocation4]  }
  0xc0   :  { %s139_s16 = smov [#allocation5]  }
  0xc1   :  { %s72_s17 = sshll.u32 %s139_s16, 4  ;;  %s73_s17 = int_to_ptr.vmem [resolvable:$true] %s72_s17 }
  0xc2   :  { %s114_s18 = scalar_lea.vmem %s73_s17, 128  ;;  %p119_p6 = scmp.lt.s32.totalorder %s73_s17, %s73_s17 }
  0xc3   :  { %p115_p5 = scmp.ne.s32.totalorder %s73_s17, %s114_s18  ;;  %p120_p7 = scmp.lt.s32.totalorder %s114_s18, %s114_s18 }
  0xc5   :  { %p121_p8 = por %p120_p7, %p119_p6 }
  0xc7   :  { %p122_p9 = pnand %p121_p8, %p115_p5 }
 0x146   :  { %v50_v23 = vpop.xlane.xlu0 %49 }
 0x147   :  { %92 = vlog2.f32 %v50_v23 }
 0x154   :  { %v93_v24 = vpop.eup %92 }
 0x155   :  { %v52_v25 = vmul.f32 0.6931472, %v93_v24 }
 0x157   :  { %v53_v26 = vadd.f32 %v52_v25, %v45_v19 }
 0x159   :  { %v54_v27 = vsub.f32 %v40_v17, %v53_v26 }
 0x15b   :  { %55 = vst [vmem:[#allocation5] sm:$0xff] %v54_v27 }
 0x15c   :  { %125 = shalt.err (!%p122_p9)
}
 0x15d   :  { %75 = dma.vmem_to_hbm [thread:$0]  %s73_s17, 128, %s166_s2, [#allocation6]  }
 0x15e   :  { %134 = dma.done.wait [#allocation4], 128  }
 0x15f   :  { %135 = vsyncadd [#allocation4], 4294967168 }
 0x160   :  { %136 = dma.done.wait [#allocation6], 128  }
 0x161   :  { %137 = vsyncadd [#allocation6], 4294967168 }
 0x162   :  { %82 = vsyncpa [#allocation4], 1 }
 0x163   :  { %83 = vsyncpa [#allocation6], 1 }

</bundles_post_ra>
